<compile_context>
chip_gen: v5e
topology: v5e:2x2
jax: 0.10.0
libtpu: 0.0.40
codegen_flags: <defaults>
</compile_context>

<pallas_src>
import functools

import numpy as np
import jax
import jax.numpy as jnp
from jax.experimental import pallas as pl
from jax.experimental.pallas import tpu as pltpu

# ----- deterministic stand-ins for `settings` -----
N_CLASSES = 4                       # settings.n_classes -> clf channels = N_CLASSES + 1
ASPECT_RATIOS = (1.0, 2.0, 0.5)     # settings.aspect_ratios -> 3 priors (3 heads) per scale
C16 = 32                            # stand-in feature width at stride 16 (resnet34 layer3: 256)
C8 = 64                             # stand-in feature width at stride 32 (resnet34 layer4: 512)
C8_PAD = 128                        # downsample output padded to a full 128-lane tile
N_CLF = N_CLASSES + 1               # 5
N_REG = 4
OUT_W = 128                         # lane-dense padded width of each per-scale head slab
N_OFF = 4                           # factor-2 space-to-depth offsets (fh, fw)


# ---------------------------------------------------------------------------
# Fused Pallas kernel: backbone + stride-16 heads + space-to-depth + downsample
# + stride-8 heads.  All tiles / activations stay in VMEM/vregs.
# ---------------------------------------------------------------------------
def _detector_fused_kernel(x_ref, wbb_ref, bbb_ref, wds_ref, bds_ref,
                           wh16_ref, bh16_ref, wh8_ref, bh8_ref, seg_ref,
                           o16_ref, o8_ref, cat_ref, *, clf_w, reg_w):
    tr8 = o8_ref.shape[0]            # stride-8 rows in this grid step
    c16 = wbb_ref.shape[1]           # 32
    out_w = o16_ref.shape[1]         # 128

    # Lane masks: built once, shared by both head activations (broadcast over rows).
    lane = jax.lax.broadcasted_iota(jnp.int32, (1, out_w), 1)
    is_clf = lane < clf_w
    is_reg = (lane >= clf_w) & (lane < clf_w + reg_w)

    def activate(y):
        # Single per-row max over ALL clf lanes (softmax is shift-invariant per segment).
        m = jnp.max(jnp.where(is_clf, y, -jnp.inf), axis=-1, keepdims=True)
        e = jnp.exp(jnp.where(is_clf, y - m, -30.0))
        # Per-segment sums + broadcast as ONE matmul against a block-structured constant
        # (non-clf columns of seg have a lone diagonal 1 so denominators stay finite).
        den = jnp.dot(e, seg_ref[...], preferred_element_type=jnp.float32)
        inv = pl.reciprocal(den, approx=True)         # EUP slot
        return jnp.where(is_clf, e * inv, 0.0) + jnp.where(is_reg, jnp.tanh(y), 0.0)

    # Backbone stand-in: ONE (N_OFF*tr8, Cin) x (Cin, C16) matmul + ReLU.
    feat16 = jnp.dot(x_ref[...], wbb_ref[...], preferred_element_type=jnp.float32)
    feat16 = jnp.maximum(feat16 + bbb_ref[...], 0.0)

    # All stride-16 heads fused: one lane-dense matmul + segmented softmax/tanh.
    h16 = jnp.dot(feat16.astype(jnp.bfloat16), wh16_ref[...],
                  preferred_element_type=jnp.float32) + bh16_ref[...]
    o16_ref[...] = activate(h16).astype(o16_ref.dtype)

    # Factor-2 space-to-depth: the 4 offsets are contiguous tr8-row blocks of feat16
    # (rows were pre-ordered on the wrapper side).  Lane-pack them into a
    # (tr8, N_OFF*C16 = 128) scratch -> ONE K=128 downsample matmul.  No one-hot gathers.
    for p in range(N_OFF):
        cat_ref[:, p * c16:(p + 1) * c16] = feat16[p * tr8:(p + 1) * tr8, :]
    feat8 = jnp.dot(cat_ref[...].astype(jnp.bfloat16), wds_ref[...],
                    preferred_element_type=jnp.float32)
    feat8 = jnp.maximum(feat8 + bds_ref[...], 0.0)

    # All stride-8 heads fused.
    h8 = jnp.dot(feat8.astype(jnp.bfloat16), wh8_ref[...],
                 preferred_element_type=jnp.float32) + bh8_ref[...]
    o8_ref[...] = activate(h8).astype(o8_ref.dtype)


def detector_fused(x_rows, w_bb, b_bb, w_ds, b_ds, wh16, bh16, wh8, bh8, seg_mat,
                   *, tr8, clf_w, reg_w):
    """x_rows: (N_OFF*R8, Cin) bf16 stride-16 rows, tile-major / offset-major ordered.
    Returns two bf16 lane-dense head slabs: (N_OFF*R8, 128) and (R8, 128)."""
    r16, cin = x_rows.shape
    r8 = r16 // N_OFF
    assert r8 % tr8 == 0, (r8, tr8)
    n_tiles = r8 // tr8
    out_w = wh16.shape[1]
    kernel = functools.partial(_detector_fused_kernel, clf_w=clf_w, reg_w=reg_w)

    def const_spec(a):
        nd = a.ndim
        return pl.BlockSpec(a.shape, lambda i, _nd=nd: (0,) * _nd)   # never re-DMA'd

    weights = (w_bb, b_bb, w_ds, b_ds, wh16, bh16, wh8, bh8, seg_mat)
    return pl.pallas_call(
        kernel,
        out_shape=(jax.ShapeDtypeStruct((r16, out_w), jnp.bfloat16),
                   jax.ShapeDtypeStruct((r8, out_w), jnp.bfloat16)),
        grid=(n_tiles,),
        in_specs=[pl.BlockSpec((N_OFF * tr8, cin), lambda i: (i, 0))]
                 + [const_spec(a) for a in weights],
        out_specs=(pl.BlockSpec((N_OFF * tr8, out_w), lambda i: (i, 0)),
                   pl.BlockSpec((tr8, out_w), lambda i: (i, 0))),
        scratch_shapes=[pltpu.VMEM((tr8, N_OFF * w_bb.shape[1]), jnp.float32)],
        compiler_params=pltpu.CompilerParams(dimension_semantics=("parallel",)),
    )(x_rows, *weights)


# ---------------------------------------------------------------------------
# Plain-JAX glue: input layout plumbing (no compute)
# ---------------------------------------------------------------------------
def _row_tile(r8, max_tile=512):
    """Stride-8 rows per grid step.  512 keeps the per-step working set comfortably under
    v7x's 32 MiB default scoped VMEM; use ~256 on v5e (16 MiB default, 1 store slot)."""
    if r8 <= max_tile:
        return r8
    t = max_tile - max_tile % 16
    while t >= 16:
        if r8 % t == 0:
            return t
        t -= 16
    return r8   # TODO(synk): pad the row count instead of falling back to fully-resident


def nchw_to_rows(x_nchw, tr8):
    """Stride-16 space-to-depth rows, ordered so that within each tr8-row grid tile the
    four factor-2 space-to-depth offsets occupy contiguous tr8-row blocks (offset-major)."""
    B, C, H, W = x_nchw.shape
    assert H % 32 == 0 and W % 32 == 0, (H, W)
    Hp, Wp = H // 16, W // 16
    H8, W8 = Hp // 2, Wp // 2
    r8 = B * H8 * W8
    assert r8 % tr8 == 0, (r8, tr8)
    cin = 16 * 16 * C
    x = jnp.transpose(x_nchw, (0, 2, 3, 1))                       # NHWC
    x = x.reshape(B, H8, 2, 16, W8, 2, 16, C)                     # b,h8,fh,i,w8,fw,j,c
    x = jnp.transpose(x, (0, 1, 4, 2, 5, 3, 6, 7))                # b,h8,w8,fh,fw,i,j,c
    x = x.reshape(r8, N_OFF, cin)
    x = x.reshape(r8 // tr8, tr8, N_OFF, cin)
    x = jnp.transpose(x, (0, 2, 1, 3)).reshape(N_OFF * r8, cin)   # tile-major, offset-major
    return x, (B, Hp, Wp)


# ---------------------------------------------------------------------------
# Priors (faithful port of Detector.get_priors; used only to count heads)
# ---------------------------------------------------------------------------
def get_priors(side_div, anchor_side, aspect_ratios=ASPECT_RATIOS):
    prior_tensors = []
    xy = jnp.arange(0, 1, 1.0 / side_div) + 1.0 / side_div / 2.0
    yy, xx = jnp.meshgrid(xy, xy, indexing="ij")
    for a in anchor_side:
        for aspect in aspect_ratios:
            w = jnp.ones_like(yy) * a * jnp.sqrt(aspect)
            h = jnp.ones_like(yy) * a / jnp.sqrt(aspect)
            prior_tensors.append(jnp.stack([yy, xx, h, w], axis=-1))
    return prior_tensors


# ---------------------------------------------------------------------------
# Detector
# ---------------------------------------------------------------------------
class DetectorPallas:
    def __init__(self, key, img_hw=(64, 64)):
        self.img_hw = img_hw
        self.priors16 = get_priors(16, [0.2])
        self.priors8 = get_priors(8, [0.4])
        self.priors = self.priors16 + self.priors8

        def dense(k, cin, cout, scale=0.05):
            kw, kb = jax.random.split(k)
            return (scale * jax.random.normal(kw, (cin, cout), jnp.float32),
                    scale * jax.random.normal(kb, (cout,), jnp.float32))

        n16, n8 = len(self.priors16), len(self.priors8)
        assert n16 == n8 == 3
        self.n_heads16, self.n_heads8 = n16, n8
        keys = jax.random.split(key, 2 + 2 * n16 + 2 * n8)

        # backbone stand-in: stride-16 space-to-depth -> 1x1 conv -> ReLU
        w_bb, b_bb = dense(keys[0], 16 * 16 * 3, C16)
        # downsample stand-in: factor-2 space-to-depth (lane-packed 4*C16) -> 1x1 conv -> ReLU
        w_ds, b_ds = dense(keys[1], N_OFF * C16, C8)

        idx = 2
        det16, det8 = [], []
        for _ in range(n16):
            wc, bc = dense(keys[idx], C16, N_CLF); idx += 1
            wr, br = dense(keys[idx], C16, N_REG); idx += 1
            det16.append((wc, bc, wr, br))
        for _ in range(n8):
            wc, bc = dense(keys[idx], C8, N_CLF); idx += 1
            wr, br = dense(keys[idx], C8, N_REG); idx += 1
            det8.append((wc, bc, wr, br))

        # ---- fuse per-head weights into one lane-dense (Cin, 128) matmul per scale
        def cat_heads(heads, cin_pad):
            wcs = [wc for (wc, _, _, _) in heads]
            wrs = [wr for (_, _, wr, _) in heads]
            bcs = [bc for (_, bc, _, _) in heads]
            brs = [br for (_, _, _, br) in heads]
            w = jnp.concatenate(wcs + wrs, axis=1)              # (cin, 3*5 + 3*4)
            b = jnp.concatenate(bcs + brs, axis=0)              # (27,)
            w = jnp.pad(w, ((0, cin_pad - w.shape[0]), (0, OUT_W - w.shape[1])))
            b = jnp.pad(b, (0, OUT_W - b.shape[0]))
            return w.astype(jnp.bfloat16), b.reshape(1, OUT_W).astype(jnp.float32)

        self.wh16, self.bh16 = cat_heads(det16, C16)
        self.wh8, self.bh8 = cat_heads(det8, C8_PAD)            # zero rows for padded channels

        # bf16 matmul operands; f32 biases (elementwise math stays f32 on all gens)
        self.w_bb = w_bb.astype(jnp.bfloat16)
        self.b_bb = b_bb.reshape(1, C16).astype(jnp.float32)
        # downsample output padded to 128 lanes (padded channels are 0 through ReLU and
        # multiply zero head-weight rows -> no effect, better MXU column fill)
        self.w_ds = jnp.pad(w_ds, ((0, 0), (0, C8_PAD - C8))).astype(jnp.bfloat16)
        self.b_ds = jnp.pad(b_ds, (0, C8_PAD - C8)).reshape(1, C8_PAD).astype(jnp.float32)

        # block-structured segment-sum matrix for the in-kernel softmax denominators
        clf_w = n16 * N_CLF
        S = np.zeros((OUT_W, OUT_W), np.float32)
        for s in range(n16):
            S[s * N_CLF:(s + 1) * N_CLF, s * N_CLF:(s + 1) * N_CLF] = 1.0
        S[np.arange(clf_w, OUT_W), np.arange(clf_w, OUT_W)] = 1.0   # finite non-clf denoms
        self.seg_mat = jnp.asarray(S)

        self._forward = jax.jit(self._forward_impl)

    # ---- wrapper-side output split: reshape/transpose layout plumbing + channel slices
    def _channels_to_dicts(self, x, n_heads):
        clf_tot = n_heads * N_CLF
        outs = []
        for hd in range(n_heads):
            clf = x[:, hd * N_CLF:(hd + 1) * N_CLF]
            reg = x[:, clf_tot + hd * N_REG: clf_tot + (hd + 1) * N_REG]
            outs.append({"clf": clf, "reg": reg})
        return outs

    def _split_heads16(self, slab, B, Hp, Wp, tr8, n_heads):
        H8, W8 = Hp // 2, Wp // 2
        r8 = B * H8 * W8
        used = n_heads * (N_CLF + N_REG)
        x = slab[:, :used].astype(jnp.float32)
        x = x.reshape(r8 // tr8, N_OFF, tr8, used)
        x = jnp.transpose(x, (0, 2, 1, 3)).reshape(B, H8, W8, 2, 2, used)
        x = jnp.transpose(x, (0, 5, 1, 3, 2, 4)).reshape(B, used, Hp, Wp)   # NCHW
        return self._channels_to_dicts(x, n_heads)

    def _split_heads8(self, slab, B, H8, W8, n_heads):
        used = n_heads * (N_CLF + N_REG)
        x = slab[:, :used].astype(jnp.float32).reshape(B, H8, W8, used)
        x = jnp.transpose(x, (0, 3, 1, 2))                                  # NCHW
        return self._channels_to_dicts(x, n_heads)

    def _forward_impl(self, x_nchw):
        B, C, H, W = x_nchw.shape
        Hp, Wp = H // 16, W // 16
        H8, W8 = Hp // 2, Wp // 2
        r8 = B * H8 * W8
        tr8 = _row_tile(r8)
        rows, _ = nchw_to_rows(x_nchw, tr8)                 # stride-16 input layout prep
        slab16, slab8 = detector_fused(
            rows.astype(jnp.bfloat16),
            self.w_bb, self.b_bb, self.w_ds, self.b_ds,
            self.wh16, self.bh16, self.wh8, self.bh8, self.seg_mat,
            tr8=tr8, clf_w=self.n_heads16 * N_CLF, reg_w=self.n_heads16 * N_REG)
        det16 = self._split_heads16(slab16, B, Hp, Wp, tr8, self.n_heads16)
        det8 = self._split_heads8(slab8, B, H8, W8, self.n_heads8)
        return det16 + det8

    def forward(self, x_nchw):
        return self._forward(x_nchw)


if __name__ == "__main__":
    key = jax.random.PRNGKey(0)
    pkey, xkey = jax.random.split(key)
    model = DetectorPallas(pkey)
    x = jax.random.normal(xkey, (2, 3, 64, 64), dtype=jnp.float32)  # small NCHW image batch

    out = model.forward(x)
    jax.block_until_ready(out)

    # sanity: 3 heads at stride 16 + 3 at stride 32, NCHW outputs, softmax sums to ~1
    assert len(out) == 6
    assert out[0]["clf"].shape == (2, N_CLASSES + 1, 4, 4)
    assert out[0]["reg"].shape == (2, 4, 4, 4)
    assert out[-1]["clf"].shape == (2, N_CLASSES + 1, 2, 2)
    assert out[-1]["reg"].shape == (2, 4, 2, 2)
    # approx-reciprocal softmax + bf16 output slabs: sums are 1 to within ~1e-2
    s = jnp.sum(out[0]["clf"], axis=1)
    assert bool(jnp.allclose(s, 1.0, atol=2e-2))
    s8 = jnp.sum(out[-1]["clf"], axis=1)
    assert bool(jnp.allclose(s8, 1.0, atol=2e-2))
    assert bool(jnp.all(jnp.abs(out[0]["reg"]) <= 1.0 + 1e-5))

    print("KERNEL_OK")
</pallas_src>

<mosaic_0001>
module attributes {stable_mosaic.version = 11 : i64} {
  func.func @_detector_fused_kernel(%arg0: i32, %arg1: memref<32x768xbf16, #tpu.memory_space<vmem>>, %arg2: memref<768x32xbf16, #tpu.memory_space<vmem>>, %arg3: memref<1x32xf32, #tpu.memory_space<vmem>>, %arg4: memref<128x128xbf16, #tpu.memory_space<vmem>>, %arg5: memref<1x128xf32, #tpu.memory_space<vmem>>, %arg6: memref<32x128xbf16, #tpu.memory_space<vmem>>, %arg7: memref<1x128xf32, #tpu.memory_space<vmem>>, %arg8: memref<128x128xbf16, #tpu.memory_space<vmem>>, %arg9: memref<1x128xf32, #tpu.memory_space<vmem>>, %arg10: memref<128x128xf32, #tpu.memory_space<vmem>>, %arg11: memref<32x128xbf16, #tpu.memory_space<vmem>>, %arg12: memref<8x128xbf16, #tpu.memory_space<vmem>>, %arg13: memref<8x128xf32, #tpu.memory_space<vmem>>) attributes {dimension_semantics = [#tpu.dimension_semantics<parallel>], iteration_bounds = array<i64: 1>, scalar_prefetch = 0 : i64, scratch_operands = 1 : i64, tpu.core_type = #tpu.core_type<tc>, window_params = [{transform_indices = @transform_0, window_bounds = array<i64: 32, 768>}, {pipeline_mode = #tpu.pipeline_mode<synchronous>, transform_indices = @transform_1, window_bounds = array<i64: 768, 32>}, {pipeline_mode = #tpu.pipeline_mode<synchronous>, transform_indices = @transform_2, window_bounds = array<i64: 1, 32>}, {pipeline_mode = #tpu.pipeline_mode<synchronous>, transform_indices = @transform_3, window_bounds = array<i64: 128, 128>}, {pipeline_mode = #tpu.pipeline_mode<synchronous>, transform_indices = @transform_4, window_bounds = array<i64: 1, 128>}, {pipeline_mode = #tpu.pipeline_mode<synchronous>, transform_indices = @transform_5, window_bounds = array<i64: 32, 128>}, {pipeline_mode = #tpu.pipeline_mode<synchronous>, transform_indices = @transform_6, window_bounds = array<i64: 1, 128>}, {pipeline_mode = #tpu.pipeline_mode<synchronous>, transform_indices = @transform_7, window_bounds = array<i64: 128, 128>}, {pipeline_mode = #tpu.pipeline_mode<synchronous>, transform_indices = @transform_8, window_bounds = array<i64: 1, 128>}, {pipeline_mode = #tpu.pipeline_mode<synchronous>, transform_indices = @transform_9, window_bounds = array<i64: 128, 128>}, {transform_indices = @transform_10, window_bounds = array<i64: 32, 128>}, {transform_indices = @transform_11, window_bounds = array<i64: 8, 128>}]} {
    %0 = tpu.iota {dimensions = array<i32: 1>} : vector<1x128xi32>
    %c15_i32 = arith.constant 15 : i32
    %1 = vector.broadcast %c15_i32 : i32 to vector<1x128xi32>
    %2 = arith.cmpi slt, %0, %1 : vector<1x128xi32>
    %c15_i32_0 = arith.constant 15 : i32
    %3 = vector.broadcast %c15_i32_0 : i32 to vector<1x128xi32>
    %4 = arith.cmpi sge, %0, %3 : vector<1x128xi32>
    %c27_i32 = arith.constant 27 : i32
    %5 = vector.broadcast %c27_i32 : i32 to vector<1x128xi32>
    %6 = arith.cmpi slt, %0, %5 : vector<1x128xi32>
    %7 = arith.andi %4, %6 : vector<1x128xi1>
    %c0 = arith.constant 0 : index
    %c0_1 = arith.constant 0 : index
    %8 = vector.load %arg1[%c0, %c0_1] : memref<32x768xbf16, #tpu.memory_space<vmem>>, vector<32x768xbf16>
    %c0_2 = arith.constant 0 : index
    %c0_3 = arith.constant 0 : index
    %9 = vector.load %arg2[%c0_2, %c0_3] : memref<768x32xbf16, #tpu.memory_space<vmem>>, vector<768x32xbf16>
    %cst = arith.constant dense<0.000000e+00> : vector<32x32xf32>
    %10 = tpu.matmul %8, %9, %cst {dimension_numbers = #tpu.dot_dimension_numbers<[1], [0], [0], [1], [0, 0, 1, 1], [], []>} : vector<32x768xbf16>, vector<768x32xbf16>, vector<32x32xf32> -> vector<32x32xf32>
    %c0_4 = arith.constant 0 : index
    %c0_5 = arith.constant 0 : index
    %11 = vector.load %arg3[%c0_4, %c0_5] : memref<1x32xf32, #tpu.memory_space<vmem>>, vector<1x32xf32>
    %12 = vector.broadcast %11 : vector<1x32xf32> to vector<32x32xf32>
    %13 = arith.addf %10, %12 : vector<32x32xf32>
    %cst_6 = arith.constant 0.000000e+00 : f32
    %14 = vector.broadcast %cst_6 : f32 to vector<32x32xf32>
    %15 = arith.maximumf %13, %14 : vector<32x32xf32>
    %16 = arith.truncf %15 : vector<32x32xf32> to vector<32x32xbf16>
    %c0_7 = arith.constant 0 : index
    %c0_8 = arith.constant 0 : index
    %17 = vector.load %arg6[%c0_7, %c0_8] : memref<32x128xbf16, #tpu.memory_space<vmem>>, vector<32x128xbf16>
    %cst_9 = arith.constant dense<0.000000e+00> : vector<32x128xf32>
    %18 = tpu.matmul %16, %17, %cst_9 {dimension_numbers = #tpu.dot_dimension_numbers<[1], [0], [0], [1], [0, 0, 1, 1], [], []>} : vector<32x32xbf16>, vector<32x128xbf16>, vector<32x128xf32> -> vector<32x128xf32>
    %c0_10 = arith.constant 0 : index
    %c0_11 = arith.constant 0 : index
    %19 = vector.load %arg7[%c0_10, %c0_11] : memref<1x128xf32, #tpu.memory_space<vmem>>, vector<1x128xf32>
    %20 = vector.broadcast %19 : vector<1x128xf32> to vector<32x128xf32>
    %21 = arith.addf %18, %20 : vector<32x128xf32>
    %cst_12 = arith.constant 0xFF800000 : f32
    %22 = vector.shape_cast %2 : vector<1x128xi1> to vector<1x128xi1>
    %23 = vector.broadcast %22 : vector<1x128xi1> to vector<32x128xi1>
    %24 = vector.broadcast %cst_12 : f32 to vector<32x128xf32>
    %25 = arith.select %23, %21, %24 : vector<32x128xi1>, vector<32x128xf32>
    %cst_13 = arith.constant dense<0xFF800000> : vector<32xf32>
    %26 = vector.multi_reduction <maximumf>, %25, %cst_13 [1] : vector<32x128xf32> to vector<32xf32>
    %27 = vector.shape_cast %26 : vector<32xf32> to vector<32x1xf32>
    %28 = vector.broadcast %27 : vector<32x1xf32> to vector<32x128xf32>
    %29 = arith.subf %21, %28 : vector<32x128xf32>
    %cst_14 = arith.constant -3.000000e+01 : f32
    %30 = vector.shape_cast %2 : vector<1x128xi1> to vector<1x128xi1>
    %31 = vector.broadcast %30 : vector<1x128xi1> to vector<32x128xi1>
    %32 = vector.broadcast %cst_14 : f32 to vector<32x128xf32>
    %33 = arith.select %31, %29, %32 : vector<32x128xi1>, vector<32x128xf32>
    %34 = math.exp %33 : vector<32x128xf32>
    %c0_15 = arith.constant 0 : index
    %c0_16 = arith.constant 0 : index
    %35 = vector.load %arg10[%c0_15, %c0_16] : memref<128x128xf32, #tpu.memory_space<vmem>>, vector<128x128xf32>
    %cst_17 = arith.constant dense<0.000000e+00> : vector<32x128xf32>
    %36 = tpu.matmul %34, %35, %cst_17 {dimension_numbers = #tpu.dot_dimension_numbers<[1], [0], [0], [1], [0, 0, 1, 1], [], []>} : vector<32x128xf32>, vector<128x128xf32>, vector<32x128xf32> -> vector<32x128xf32>
    %37 = tpu.reciprocal %36 {approx = true} : vector<32x128xf32> -> vector<32x128xf32>
    %38 = arith.mulf %34, %37 : vector<32x128xf32>
    %cst_18 = arith.constant 0.000000e+00 : f32
    %39 = vector.shape_cast %2 : vector<1x128xi1> to vector<1x128xi1>
    %40 = vector.broadcast %39 : vector<1x128xi1> to vector<32x128xi1>
    %41 = vector.broadcast %cst_18 : f32 to vector<32x128xf32>
    %42 = arith.select %40, %38, %41 : vector<32x128xi1>, vector<32x128xf32>
    %43 = math.tanh %21 : vector<32x128xf32>
    %cst_19 = arith.constant 0.000000e+00 : f32
    %44 = vector.shape_cast %7 : vector<1x128xi1> to vector<1x128xi1>
    %45 = vector.broadcast %44 : vector<1x128xi1> to vector<32x128xi1>
    %46 = vector.broadcast %cst_19 : f32 to vector<32x128xf32>
    %47 = arith.select %45, %43, %46 : vector<32x128xi1>, vector<32x128xf32>
    %48 = arith.addf %42, %47 : vector<32x128xf32>
    %49 = arith.truncf %48 : vector<32x128xf32> to vector<32x128xbf16>
    %c0_20 = arith.constant 0 : index
    %c0_21 = arith.constant 0 : index
    %50 = vector.load %arg11[%c0_20, %c0_21] : memref<32x128xbf16, #tpu.memory_space<vmem>>, vector<32x128xbf16>
    tpu.vector_store %arg11[%c0_20, %c0_21], %49 {strides = array<i32>} : memref<32x128xbf16, #tpu.memory_space<vmem>>, vector<32x128xbf16>,
    %51 = vector.extract_strided_slice %15 {offsets = [0, 0], sizes = [8, 32], strides = [1, 1]} : vector<32x32xf32> to vector<8x32xf32>
    %c0_22 = arith.constant 0 : index
    %c0_23 = arith.constant 0 : index
    %52 = vector.load %arg13[%c0_22, %c0_23] : memref<8x128xf32, #tpu.memory_space<vmem>>, vector<8x32xf32>
    tpu.vector_store %arg13[%c0_22, %c0_23], %51 {strides = array<i32>} : memref<8x128xf32, #tpu.memory_space<vmem>>, vector<8x32xf32>,
    %53 = vector.extract_strided_slice %15 {offsets = [8, 0], sizes = [8, 32], strides = [1, 1]} : vector<32x32xf32> to vector<8x32xf32>
    %c0_24 = arith.constant 0 : index
    %c32 = arith.constant 32 : index
    %54 = vector.load %arg13[%c0_24, %c32] : memref<8x128xf32, #tpu.memory_space<vmem>>, vector<8x32xf32>
    tpu.vector_store %arg13[%c0_24, %c32], %53 {strides = array<i32>} : memref<8x128xf32, #tpu.memory_space<vmem>>, vector<8x32xf32>,
    %55 = vector.extract_strided_slice %15 {offsets = [16, 0], sizes = [8, 32], strides = [1, 1]} : vector<32x32xf32> to vector<8x32xf32>
    %c0_25 = arith.constant 0 : index
    %c64 = arith.constant 64 : index
    %56 = vector.load %arg13[%c0_25, %c64] : memref<8x128xf32, #tpu.memory_space<vmem>>, vector<8x32xf32>
    tpu.vector_store %arg13[%c0_25, %c64], %55 {strides = array<i32>} : memref<8x128xf32, #tpu.memory_space<vmem>>, vector<8x32xf32>,
    %57 = vector.extract_strided_slice %15 {offsets = [24, 0], sizes = [8, 32], strides = [1, 1]} : vector<32x32xf32> to vector<8x32xf32>
    %c0_26 = arith.constant 0 : index
    %c96 = arith.constant 96 : index
    %58 = vector.load %arg13[%c0_26, %c96] : memref<8x128xf32, #tpu.memory_space<vmem>>, vector<8x32xf32>
    tpu.vector_store %arg13[%c0_26, %c96], %57 {strides = array<i32>} : memref<8x128xf32, #tpu.memory_space<vmem>>, vector<8x32xf32>,
    %c0_27 = arith.constant 0 : index
    %c0_28 = arith.constant 0 : index
    %59 = vector.load %arg13[%c0_27, %c0_28] : memref<8x128xf32, #tpu.memory_space<vmem>>, vector<8x128xf32>
    %60 = arith.truncf %59 : vector<8x128xf32> to vector<8x128xbf16>
    %c0_29 = arith.constant 0 : index
    %c0_30 = arith.constant 0 : index
    %61 = vector.load %arg4[%c0_29, %c0_30] : memref<128x128xbf16, #tpu.memory_space<vmem>>, vector<128x128xbf16>
    %cst_31 = arith.constant dense<0.000000e+00> : vector<8x128xf32>
    %62 = tpu.matmul %60, %61, %cst_31 {dimension_numbers = #tpu.dot_dimension_numbers<[1], [0], [0], [1], [0, 0, 1, 1], [], []>} : vector<8x128xbf16>, vector<128x128xbf16>, vector<8x128xf32> -> vector<8x128xf32>
    %c0_32 = arith.constant 0 : index
    %c0_33 = arith.constant 0 : index
    %63 = vector.load %arg5[%c0_32, %c0_33] : memref<1x128xf32, #tpu.memory_space<vmem>>, vector<1x128xf32>
    %64 = vector.broadcast %63 : vector<1x128xf32> to vector<8x128xf32>
    %65 = arith.addf %62, %64 : vector<8x128xf32>
    %cst_34 = arith.constant 0.000000e+00 : f32
    %66 = vector.broadcast %cst_34 : f32 to vector<8x128xf32>
    %67 = arith.maximumf %65, %66 : vector<8x128xf32>
    %68 = arith.truncf %67 : vector<8x128xf32> to vector<8x128xbf16>
    %c0_35 = arith.constant 0 : index
    %c0_36 = arith.constant 0 : index
    %69 = vector.load %arg8[%c0_35, %c0_36] : memref<128x128xbf16, #tpu.memory_space<vmem>>, vector<128x128xbf16>
    %cst_37 = arith.constant dense<0.000000e+00> : vector<8x128xf32>
    %70 = tpu.matmul %68, %69, %cst_37 {dimension_numbers = #tpu.dot_dimension_numbers<[1], [0], [0], [1], [0, 0, 1, 1], [], []>} : vector<8x128xbf16>, vector<128x128xbf16>, vector<8x128xf32> -> vector<8x128xf32>
    %c0_38 = arith.constant 0 : index
    %c0_39 = arith.constant 0 : index
    %71 = vector.load %arg9[%c0_38, %c0_39] : memref<1x128xf32, #tpu.memory_space<vmem>>, vector<1x128xf32>
    %72 = vector.broadcast %71 : vector<1x128xf32> to vector<8x128xf32>
    %73 = arith.addf %70, %72 : vector<8x128xf32>
    %cst_40 = arith.constant 0xFF800000 : f32
    %74 = vector.shape_cast %2 : vector<1x128xi1> to vector<1x128xi1>
    %75 = vector.broadcast %74 : vector<1x128xi1> to vector<8x128xi1>
    %76 = vector.broadcast %cst_40 : f32 to vector<8x128xf32>
    %77 = arith.select %75, %73, %76 : vector<8x128xi1>, vector<8x128xf32>
    %cst_41 = arith.constant dense<0xFF800000> : vector<8xf32>
    %78 = vector.multi_reduction <maximumf>, %77, %cst_41 [1] : vector<8x128xf32> to vector<8xf32>
    %79 = vector.shape_cast %78 : vector<8xf32> to vector<8x1xf32>
    %80 = vector.broadcast %79 : vector<8x1xf32> to vector<8x128xf32>
    %81 = arith.subf %73, %80 : vector<8x128xf32>
    %cst_42 = arith.constant -3.000000e+01 : f32
    %82 = vector.shape_cast %2 : vector<1x128xi1> to vector<1x128xi1>
    %83 = vector.broadcast %82 : vector<1x128xi1> to vector<8x128xi1>
    %84 = vector.broadcast %cst_42 : f32 to vector<8x128xf32>
    %85 = arith.select %83, %81, %84 : vector<8x128xi1>, vector<8x128xf32>
    %86 = math.exp %85 : vector<8x128xf32>
    %c0_43 = arith.constant 0 : index
    %c0_44 = arith.constant 0 : index
    %87 = vector.load %arg10[%c0_43, %c0_44] : memref<128x128xf32, #tpu.memory_space<vmem>>, vector<128x128xf32>
    %cst_45 = arith.constant dense<0.000000e+00> : vector<8x128xf32>
    %88 = tpu.matmul %86, %87, %cst_45 {dimension_numbers = #tpu.dot_dimension_numbers<[1], [0], [0], [1], [0, 0, 1, 1], [], []>} : vector<8x128xf32>, vector<128x128xf32>, vector<8x128xf32> -> vector<8x128xf32>
    %89 = tpu.reciprocal %88 {approx = true} : vector<8x128xf32> -> vector<8x128xf32>
    %90 = arith.mulf %86, %89 : vector<8x128xf32>
    %cst_46 = arith.constant 0.000000e+00 : f32
    %91 = vector.shape_cast %2 : vector<1x128xi1> to vector<1x128xi1>
    %92 = vector.broadcast %91 : vector<1x128xi1> to vector<8x128xi1>
    %93 = vector.broadcast %cst_46 : f32 to vector<8x128xf32>
    %94 = arith.select %92, %90, %93 : vector<8x128xi1>, vector<8x128xf32>
    %95 = math.tanh %73 : vector<8x128xf32>
    %cst_47 = arith.constant 0.000000e+00 : f32
    %96 = vector.shape_cast %7 : vector<1x128xi1> to vector<1x128xi1>
    %97 = vector.broadcast %96 : vector<1x128xi1> to vector<8x128xi1>
    %98 = vector.broadcast %cst_47 : f32 to vector<8x128xf32>
    %99 = arith.select %97, %95, %98 : vector<8x128xi1>, vector<8x128xf32>
    %100 = arith.addf %94, %99 : vector<8x128xf32>
    %101 = arith.truncf %100 : vector<8x128xf32> to vector<8x128xbf16>
    %c0_48 = arith.constant 0 : index
    %c0_49 = arith.constant 0 : index
    %102 = vector.load %arg12[%c0_48, %c0_49] : memref<8x128xbf16, #tpu.memory_space<vmem>>, vector<8x128xbf16>
    tpu.vector_store %arg12[%c0_48, %c0_49], %101 {strides = array<i32>} : memref<8x128xbf16, #tpu.memory_space<vmem>>, vector<8x128xbf16>,
    return
  }
  func.func @transform_0(%arg0: i32) -> (i32, i32) {
    %c0_i32 = arith.constant 0 : i32
    %c0_i32_0 = arith.constant 0 : i32
    return %arg0, %c0_i32 : i32, i32
  }
  func.func @transform_1(%arg0: i32) -> (i32, i32) {
    %c0_i32 = arith.constant 0 : i32
    %c0_i32_0 = arith.constant 0 : i32
    %c0_i32_1 = arith.constant 0 : i32
    return %c0_i32, %c0_i32_0 : i32, i32
  }
  func.func @transform_2(%arg0: i32) -> (i32, i32) {
    %c0_i32 = arith.constant 0 : i32
    %c0_i32_0 = arith.constant 0 : i32
    %c0_i32_1 = arith.constant 0 : i32
    return %c0_i32, %c0_i32_0 : i32, i32
  }
  func.func @transform_3(%arg0: i32) -> (i32, i32) {
    %c0_i32 = arith.constant 0 : i32
    %c0_i32_0 = arith.constant 0 : i32
    %c0_i32_1 = arith.constant 0 : i32
    return %c0_i32, %c0_i32_0 : i32, i32
  }
  func.func @transform_4(%arg0: i32) -> (i32, i32) {
    %c0_i32 = arith.constant 0 : i32
    %c0_i32_0 = arith.constant 0 : i32
    %c0_i32_1 = arith.constant 0 : i32
    return %c0_i32, %c0_i32_0 : i32, i32
  }
  func.func @transform_5(%arg0: i32) -> (i32, i32) {
    %c0_i32 = arith.constant 0 : i32
    %c0_i32_0 = arith.constant 0 : i32
    %c0_i32_1 = arith.constant 0 : i32
    return %c0_i32, %c0_i32_0 : i32, i32
  }
  func.func @transform_6(%arg0: i32) -> (i32, i32) {
    %c0_i32 = arith.constant 0 : i32
    %c0_i32_0 = arith.constant 0 : i32
    %c0_i32_1 = arith.constant 0 : i32
    return %c0_i32, %c0_i32_0 : i32, i32
  }
  func.func @transform_7(%arg0: i32) -> (i32, i32) {
    %c0_i32 = arith.constant 0 : i32
    %c0_i32_0 = arith.constant 0 : i32
    %c0_i32_1 = arith.constant 0 : i32
    return %c0_i32, %c0_i32_0 : i32, i32
  }
  func.func @transform_8(%arg0: i32) -> (i32, i32) {
    %c0_i32 = arith.constant 0 : i32
    %c0_i32_0 = arith.constant 0 : i32
    %c0_i32_1 = arith.constant 0 : i32
    return %c0_i32, %c0_i32_0 : i32, i32
  }
  func.func @transform_9(%arg0: i32) -> (i32, i32) {
    %c0_i32 = arith.constant 0 : i32
    %c0_i32_0 = arith.constant 0 : i32
    %c0_i32_1 = arith.constant 0 : i32
    return %c0_i32, %c0_i32_0 : i32, i32
  }
  func.func @transform_10(%arg0: i32) -> (i32, i32) {
    %c0_i32 = arith.constant 0 : i32
    %c0_i32_0 = arith.constant 0 : i32
    return %arg0, %c0_i32 : i32, i32
  }
  func.func @transform_11(%arg0: i32) -> (i32, i32) {
    %c0_i32 = arith.constant 0 : i32
    %c0_i32_0 = arith.constant 0 : i32
    return %arg0, %c0_i32 : i32, i32
  }
}

</mosaic_0001>

<bundles_post_ra>
// kernel: _forward_impl.1
= control target key start
LH: loop header
LB: loop body
LE: loop exit
PB: predicated region body
PF: predicated region fallthrough
CT: control target
= control target key end

     0   :  { %vm644_vm0 = vcmask 261120   ;;  %s1463_s15 = smov 32   ;;  %s1464_s16 = smov 64   ;;  %vm784_vm1 = vcmask 523520   ;;  %vm790_vm2 = vcmask 785920   ;;  %vm796_vm3 = vcmask 1048320   ;;  %s1937_s1 = inlined_call_operand.vmem [shape: bf16[768,32], index: 1, kind: input, shape index: {}]   ;;  %s1938_s2 = inlined_call_operand.vmem [shape: f32[1,32], index: 2, kind: input, shape index: {}]   ;;  %s1939_s0 = inlined_call_operand.vmem [shape: bf16[32,768], index: 0, kind: input, shape index: {}]   ;;  %s1940_s5 = inlined_call_operand.vmem [shape: bf16[32,128], index: 5, kind: input, shape index: {}]   ;;  %s1941_s3 = inlined_call_operand.vmem [shape: bf16[128,128], index: 3, kind: input, shape index: {}]   ;;  %s1942_s6 = inlined_call_operand.vmem [shape: f32[1,128], index: 6, kind: input, shape index: {}]   ;;  %s1943_s9 = inlined_call_operand.vmem [shape: f32[128,128], index: 9, kind: input, shape index: {}]   ;;  %s1944_s7 = inlined_call_operand.vmem [shape: bf16[128,128], index: 7, kind: input, shape index: {}]   ;;  %s1945_s4 = inlined_call_operand.vmem [shape: f32[1,128], index: 4, kind: input, shape index: {}]   ;;  %s1946_s8 = inlined_call_operand.vmem [shape: f32[1,128], index: 8, kind: input, shape index: {}]   ;;  %s1947_s10 = inlined_call_operand.vmem [shape: bf16[32,128], index: 10, kind: output, shape index: {0}]   ;;  %s1948_s11 = inlined_call_operand.vmem [shape: bf16[8,128], index: 11, kind: output, shape index: {1}]  }
   0x1   :  { %v1356_v0 = vld [vmem:[%s1937_s1 + $0x38] sm:$0xff]  ;;  %v1355_v4 = vld [vmem:[%s1937_s1 + $0x30] sm:$0xff]  ;;  %v1354_v8 = vld [vmem:[%s1937_s1 + $0x28] sm:$0xff]  ;;  %s1465_s17 = smov 96  }
   0x2   :  { %v1364_v1 = vld [vmem:[%s1937_s1 + $0x78] sm:$0xff]  ;;  %504 = vmatpush.bf16.msra.mxu0 %v1356_v0  ;;  %v1363_v5 = vld [vmem:[%s1937_s1 + $0x70] sm:$0xff]  ;;  %v1362_v9 = vld [vmem:[%s1937_s1 + $0x68] sm:$0xff] }
   0x3   :  { %v1372_v2 = vld [vmem:[%s1937_s1 + $0xb8] sm:$0xff]  ;;  %523 = vmatpush.bf16.msra.mxu1 %v1364_v1  ;;  %v1371_v6 = vld [vmem:[%s1937_s1 + $0xb0] sm:$0xff]  ;;  %v1370_v10 = vld [vmem:[%s1937_s1 + $0xa8] sm:$0xff] }
   0x4   :  { %v1380_v3 = vld [vmem:[%s1937_s1 + $0xf8] sm:$0xff]  ;;  %542 = vmatpush.bf16.msra.mxu2 %v1372_v2  ;;  %v1379_v7 = vld [vmem:[%s1937_s1 + $0xf0] sm:$0xff]  ;;  %v1378_v11 = vld [vmem:[%s1937_s1 + $0xe8] sm:$0xff] }
   0x5   :  { %561 = vmatpush.bf16.msra.mxu3 %v1380_v3  ;;  %v1353_v12 = vld [vmem:[%s1937_s1 + $0x20] sm:$0xff]  ;;  %v1352_v16 = vld [vmem:[%s1937_s1 + $0x18] sm:$0xff]  ;;  %v1351_v20 = vld [vmem:[%s1937_s1 + $0x10] sm:$0xff] }
   0x6   :  { %505 = vmatpush.bf16.msra.mxu0 %v1355_v4  ;;  %v1361_v13 = vld [vmem:[%s1937_s1 + $0x60] sm:$0xff]  ;;  %v1360_v17 = vld [vmem:[%s1937_s1 + $0x58] sm:$0xff]  ;;  %v1359_v21 = vld [vmem:[%s1937_s1 + $0x50] sm:$0xff] }
   0x7   :  { %524 = vmatpush.bf16.msra.mxu1 %v1363_v5  ;;  %v1369_v14 = vld [vmem:[%s1937_s1 + $0xa0] sm:$0xff]  ;;  %v1368_v18 = vld [vmem:[%s1937_s1 + $0x98] sm:$0xff]  ;;  %v1367_v22 = vld [vmem:[%s1937_s1 + $0x90] sm:$0xff] }
   0x8   :  { %543 = vmatpush.bf16.msra.mxu2 %v1371_v6  ;;  %v1377_v15 = vld [vmem:[%s1937_s1 + $0xe0] sm:$0xff]  ;;  %v1376_v19 = vld [vmem:[%s1937_s1 + $0xd8] sm:$0xff]  ;;  %v1375_v23 = vld [vmem:[%s1937_s1 + $0xd0] sm:$0xff] }
   0x9   :  { %562 = vmatpush.bf16.msra.mxu3 %v1379_v7  ;;  %v1350_v24 = vld [vmem:[%s1937_s1 + $0x8] sm:$0xff]  ;;  %v1349_v28 = vld [vmem:[%s1937_s1] sm:$0xff]  ;;  %v1340_v33 = vld [vmem:[%s1939_s0 + $0x14] sm:$0xf0] }
   0xa   :  { %506 = vmatpush.bf16.msra.mxu0 %v1354_v8  ;;  %v1358_v25 = vld [vmem:[%s1937_s1 + $0x48] sm:$0xff]  ;;  %v1357_v29 = vld [vmem:[%s1937_s1 + $0x40] sm:$0xff]  ;;  %v1027_v35 = vld [vmem:[%s1939_s0 + $0x18] sm:$0xf0] }
   0xb   :  { %525 = vmatpush.bf16.msra.mxu1 %v1362_v9  ;;  %v1366_v26 = vld [vmem:[%s1937_s1 + $0x88] sm:$0xff]  ;;  %v1365_v30 = vld [vmem:[%s1937_s1 + $0x80] sm:$0xff]  ;;  %v1388_v40 = vld [vmem:[%s1937_s1 + $0x138] sm:$0xff] }
   0xc   :  { %544 = vmatpush.bf16.msra.mxu2 %v1370_v10  ;;  %v1374_v27 = vld [vmem:[%s1937_s1 + $0xc8] sm:$0xff]  ;;  %v1373_v31 = vld [vmem:[%s1937_s1 + $0xc0] sm:$0xff]  ;;  %v1396_v41 = vld [vmem:[%s1937_s1 + $0x178] sm:$0xff] }
   0xd   :  { %563 = vmatpush.bf16.msra.mxu3 %v1378_v11  ;;  %v1025_v32 = vld [vmem:[%s1939_s0] sm:$0xf]  ;;  %v1337_v34 = vld [vmem:[%s1939_s0 + $0x4] sm:$0xf]  ;;  %v1033_v36 = vld [vmem:[%s1939_s0 + $0x8] sm:$0xf] }
   0xe   :  { %507 = vmatpush.bf16.msra.mxu0 %v1353_v12  ;;  %v1341_v37 = vld [vmem:[%s1939_s0 + $0x1c] sm:$0xf0]  ;;  %v1338_v38 = vld [vmem:[%s1939_s0 + $0xc] sm:$0xf]  ;;  %v1035_v39 = vld [vmem:[%s1939_s0 + $0x20] sm:$0xf0]  ;;  %v1026_v42 = vor.u32 %v1340_v33, %v1025_v32  ;;  %v1030_v43 = vor.u32 %v1337_v34, %v1027_v35 }
   0xf   :  { %526 = vmatpush.bf16.msra.mxu1 %v1361_v13  ;;  %v1034_v44 = vor.u32 %v1341_v37, %v1033_v36  ;;  %v1038_v45 = vor.u32 %v1338_v38, %v1035_v39  ;;  %v1387_v46 = vld [vmem:[%s1937_s1 + $0x130] sm:$0xff]  ;;  %v1386_v48 = vld [vmem:[%s1937_s1 + $0x128] sm:$0xff]  ;;  %v1385_v50 = vld [vmem:[%s1937_s1 + $0x120] sm:$0xff] }
  0x10   :  { %545 = vmatpush.bf16.msra.mxu2 %v1369_v14  ;;  %v1395_v47 = vld [vmem:[%s1937_s1 + $0x170] sm:$0xff]  ;;  %v1394_v49 = vld [vmem:[%s1937_s1 + $0x168] sm:$0xff]  ;;  %v1393_v51 = vld [vmem:[%s1937_s1 + $0x160] sm:$0xff] }
  0x11   :  { %564 = vmatpush.bf16.msra.mxu3 %v1377_v15  ;;  %v1049_v52 = vld [vmem:[%s1939_s0 + $0x30] sm:$0xf]  ;;  %v1346_v53 = vld [vmem:[%s1939_s0 + $0x44] sm:$0xf0]  ;;  %v1343_v54 = vld [vmem:[%s1939_s0 + $0x34] sm:$0xf] }
  0x12   :  { %508 = vmatpush.bf16.msra.mxu0 %v1352_v16  ;;  %v1051_v55 = vld [vmem:[%s1939_s0 + $0x48] sm:$0xf0]  ;;  %v1057_v56 = vld [vmem:[%s1939_s0 + $0x38] sm:$0xf]  ;;  %v1347_v57 = vld [vmem:[%s1939_s0 + $0x4c] sm:$0xf0]  ;;  %v1050_v62 = vor.u32 %v1346_v53, %v1049_v52 }
  0x13   :  { %527 = vmatpush.bf16.msra.mxu1 %v1360_v17  ;;  %v1344_v58 = vld [vmem:[%s1939_s0 + $0x3c] sm:$0xf]  ;;  %v1059_v59 = vld [vmem:[%s1939_s0 + $0x50] sm:$0xf0]  ;;  %v1054_v63 = vor.u32 %v1343_v54, %v1051_v55  ;;  %v1058_v0 = vor.u32 %v1347_v57, %v1057_v56  ;;  %v1382_v4 = vld [vmem:[%s1937_s1 + $0x108] sm:$0xff] }
  0x14   :  { %546 = vmatpush.bf16.msra.mxu2 %v1368_v18  ;;  %v1384_v60 = vld [vmem:[%s1937_s1 + $0x118] sm:$0xff]  ;;  %v1062_v1 = vor.u32 %v1344_v58, %v1059_v59  ;;  %v1383_v2 = vld [vmem:[%s1937_s1 + $0x110] sm:$0xff]  ;;  %v1390_v5 = vld [vmem:[%s1937_s1 + $0x148] sm:$0xff] }
  0x15   :  { %565 = vmatpush.bf16.msra.mxu3 %v1376_v19  ;;  %v1392_v61 = vld [vmem:[%s1937_s1 + $0x158] sm:$0xff]  ;;  %v1391_v3 = vld [vmem:[%s1937_s1 + $0x150] sm:$0xff]  ;;  %v1381_v6 = vld [vmem:[%s1937_s1 + $0x100] sm:$0xff] }
  0x16   :  { %509 = vmatpush.bf16.msra.mxu0 %v1351_v20  ;;  %v1389_v7 = vld [vmem:[%s1937_s1 + $0x140] sm:$0xff]  ;;  %v1041_v8 = vld [vmem:[%s1939_s0 + $0x10] sm:$0xf]  ;;  %v1342_v9 = vld [vmem:[%s1939_s0 + $0x24] sm:$0xf0] }
  0x17   :  { %528 = vmatpush.bf16.msra.mxu1 %v1359_v21  ;;  %v1339_v10 = vld [vmem:[%s1939_s0 + $0x14] sm:$0xf]  ;;  %v1043_v11 = vld [vmem:[%s1939_s0 + $0x28] sm:$0xf0]  ;;  %v1042_v12 = vor.u32 %v1342_v9, %v1041_v8  ;;  %v1065_v14 = vld [vmem:[%s1939_s0 + $0x40] sm:$0xf] }
  0x18   :  { %547 = vmatpush.bf16.msra.mxu2 %v1367_v22  ;;  %v1046_v13 = vor.u32 %v1339_v10, %v1043_v11  ;;  %v1348_v15 = vld [vmem:[%s1939_s0 + $0x54] sm:$0xf0]  ;;  %v1345_v16 = vld [vmem:[%s1939_s0 + $0x44] sm:$0xf]  ;;  %v1067_v17 = vld [vmem:[%s1939_s0 + $0x58] sm:$0xf0] }
  0x19   :  { %566 = vmatpush.bf16.msra.mxu3 %v1375_v23  ;;  %v1066_v18 = vor.u32 %v1348_v15, %v1065_v14  ;;  %v1070_v19 = vor.u32 %v1345_v16, %v1067_v17  ;;  %v1404_v15 = vld [vmem:[%s1941_s3 + $0x28] sm:$0xff]  ;;  %v1403_v16 = vld [vmem:[%s1941_s3 + $0x20] sm:$0xff]  ;;  %v1402_v17 = vld [vmem:[%s1941_s3 + $0x18] sm:$0xff] }
  0x1a   :  { %510 = vmatpush.bf16.msra.mxu0 %v1350_v24  ;;  %v1398_v24 = vld [vmem:[%s1940_s5 + $0x8] sm:$0xff] }
  0x1b   :  { %529 = vmatpush.bf16.msra.mxu1 %v1358_v25  ;;  %v1397_v25 = vld [vmem:[%s1940_s5] sm:$0xff] }
  0x1c   :  { %548 = vmatpush.bf16.msra.mxu2 %v1366_v26 }
  0x1d   :  { %567 = vmatpush.bf16.msra.mxu3 %v1374_v27 }
  0x1e   :  { %511 = vmatpush.bf16.msra.mxu0 %v1349_v28  ;;  %v1429_v28 = vld [vmem:[%s1938_s2] ss:$0 sm:$0xff] }
  0x1f   :  { %530 = vmatpush.bf16.msra.mxu1 %v1357_v29 }
  0x20   :  { %549 = vmatpush.bf16.msra.mxu2 %v1365_v30 }
  0x21   :  { %568 = vmatpush.bf16.msra.mxu3 %v1373_v31  ;;  %512 = vmatmul.bf16.vlgmr.msra.gmra.mxu0 %v1026_v42 }
  0x22   :  { %580 = vmatpush.bf16.msrb.mxu0 %v1388_v40  ;;  %531 = vmatmul.bf16.vlgmr.msra.gmra.mxu1 %v1030_v43 }
  0x23   :  { %599 = vmatpush.bf16.msrb.mxu1 %v1396_v41  ;;  %550 = vmatmul.bf16.vlgmr.msra.gmra.mxu2 %v1034_v44  ;;  %v1406_v44 = vld [vmem:[%s1941_s3 + $0x38] sm:$0xff] }
  0x24   :  { %569 = vmatmul.bf16.vlgmr.msra.gmra.mxu3 %v1038_v45  ;;  %657 = vmatpush.bf16.msrb.mxu2 %v1398_v24 }
  0x26   :  { %581 = vmatpush.bf16.msrb.mxu0 %v1387_v46 }
  0x27   :  { %600 = vmatpush.bf16.msrb.mxu1 %v1395_v47  ;;  %v1405_v47 = vld [vmem:[%s1941_s3 + $0x30] sm:$0xff] }
  0x28   :  { %658 = vmatpush.bf16.msrb.mxu2 %v1397_v25  ;;  %v715_v25 = vld [vmem:[%s1943_s9 + $0x78] sm:$0xff] }
  0x29   :  { %716 = vmatpush.msrb.mxu3 %v715_v25 }
  0x2a   :  { %582 = vmatpush.bf16.msrb.mxu0 %v1386_v48 }
  0x2b   :  { %601 = vmatpush.bf16.msrb.mxu1 %v1394_v49 }
  0x2c   :  { %987 = vmatpush.msra.mxu2 %v715_v25 }
  0x2e   :  { %583 = vmatpush.bf16.msrb.mxu0 %v1385_v50 }
  0x2f   :  { %602 = vmatpush.bf16.msrb.mxu1 %v1393_v51 }
  0x31   :  { %517 = vmatmul.bf16.gmra.mxu0 %v1050_v62 }
  0x32   :  { %584 = vmatpush.bf16.msrb.mxu0 %v1384_v60  ;;  %536 = vmatmul.bf16.gmra.mxu1 %v1054_v63 }
  0x33   :  { %603 = vmatpush.bf16.msrb.mxu1 %v1392_v61  ;;  %555 = vmatmul.bf16.gmra.mxu2 %v1058_v0 }
  0x34   :  { %574 = vmatmul.bf16.gmra.mxu3 %v1062_v1 }
  0x36   :  { %585 = vmatpush.bf16.msrb.mxu0 %v1383_v2 }
  0x37   :  { %604 = vmatpush.bf16.msrb.mxu1 %v1391_v3 }
  0x3a   :  { %586 = vmatpush.bf16.msrb.mxu0 %v1382_v4 }
  0x3b   :  { %605 = vmatpush.bf16.msrb.mxu1 %v1390_v5 }
  0x3e   :  { %587 = vmatpush.bf16.msrb.mxu0 %v1381_v6 }
  0x3f   :  { %606 = vmatpush.bf16.msrb.mxu1 %v1389_v7 }
  0x41   :  { %588 = vmatmul.bf16.vlgmr.msrb.gmra.mxu0 %v1042_v12 }
  0x42   :  { %607 = vmatmul.bf16.vlgmr.msrb.gmra.mxu1 %v1046_v13  ;;  %868 = vmatpush.bf16.msra.mxu0 %v1406_v44 }
  0x46   :  { %869 = vmatpush.bf16.msra.mxu0 %v1405_v47  ;;  %v706_v47 = vld [vmem:[%s1943_s9 + $0x30] sm:$0xff] }
  0x4a   :  { %870 = vmatpush.bf16.msra.mxu0 %v1404_v15 }
  0x4e   :  { %871 = vmatpush.bf16.msra.mxu0 %v1403_v16 }
  0x51   :  { %593 = vmatmul.bf16.gmra.mxu0 %v1066_v18  ;;  %v1401_v18 = vld [vmem:[%s1941_s3 + $0x10] sm:$0xff] }
  0x52   :  { %612 = vmatmul.bf16.gmra.mxu1 %v1070_v19  ;;  %872 = vmatpush.bf16.msra.mxu0 %v1402_v17  ;;  %v1400_v19 = vld [vmem:[%s1941_s3 + $0x8] sm:$0xff] }
  0x56   :  { %873 = vmatpush.bf16.msra.mxu0 %v1401_v18 }
  0x5a   :  { %874 = vmatpush.bf16.msra.mxu0 %v1400_v19 }
  0x9e   :  { %v513_v20 = vpop.f32.mrf.mxu0 }
  0x9f   :  { %v532_v21 = vpop.f32.mrf.mxu1  ;;  %v514_v30 = vadd.f32 %v1429_v28, %v513_v20  ;;  %v1399_v20 = vld [vmem:[%s1941_s3] sm:$0xff] }
  0xa0   :  { %875 = vmatpush.bf16.msra.mxu0 %v1399_v20 }
  0xa1   :  { %v533_v34 = vadd.f32 %v532_v21, %v514_v30  ;;  %v713_v30 = vld [vmem:[%s1943_s9 + $0x68] sm:$0xff] }
  0xa6   :  { %v515_v22 = vpop.f32.mrf.mxu0  ;;  %v551_v29 = vpop.f32.mrf.mxu2 }
  0xa7   :  { %v534_v23 = vpop.f32.mrf.mxu1  ;;  %v570_v31 = vpop.f32.mrf.mxu3  ;;  %v552_v35 = vadd.f32 %v551_v29, %v533_v34  ;;  %v516_v37 = vadd.f32 %v1429_v28, %v515_v22  ;;  %v1414_v29 = vld [vmem:[%s1944_s7 + $0x38] sm:$0xff] }
  0xa8   :  { %951 = vmatpush.bf16.msra.mxu1 %v1414_v29 }
  0xa9   :  { %v571_v38 = vadd.f32 %v570_v31, %v552_v35  ;;  %v535_v42 = vadd.f32 %v534_v23, %v516_v37  ;;  %v38_v23 = vlaneseq  ;;  %v1413_v31 = vld [vmem:[%s1944_s7 + $0x30] sm:$0xff]  ;;  %v711_v35 = vld [vmem:[%s1943_s9 + $0x58] sm:$0xff]  ;;  %v1412_v37 = vld [vmem:[%s1944_s7 + $0x28] sm:$0xff] }
  0xab   :  { %v1778_v24 = vand.u32 127, %v38_v23 }
  0xac   :  { %952 = vmatpush.bf16.msra.mxu1 %v1413_v31 }
  0xad   :  { %vm40_vm4 = vcmp.lt.s32.totalorder %v1778_v24, 15  ;;  %vm41_vm5 = vcmp.ge.s32.totalorder %v1778_v24, 15  ;;  %vm42_vm6 = vcmp.lt.s32.totalorder %v1778_v24, 27 }
  0xae   :  { %v518_v26 = vpop.f32.mrf.mxu0  ;;  %v553_v36 = vpop.f32.mrf.mxu2  ;;  %vm1900_vm7 = vmand %vm41_vm5, %vm42_vm6 }
  0xaf   :  { %v537_v27 = vpop.f32.mrf.mxu1  ;;  %v572_v39 = vpop.f32.mrf.mxu3  ;;  %v554_v45 = vadd.f32 %v553_v36, %v535_v42  ;;  %v519_v48 = vadd.f32 %v1429_v28, %v518_v26  ;;  %v714_v26 = vld [vmem:[%s1943_s9 + $0x70] sm:$0xff] }
  0xb0   :  { %717 = vmatpush.msrb.mxu3 %v714_v26  ;;  %988 = vmatpush.msra.mxu2 %v714_v26 }
  0xb1   :  { %v573_v51 = vadd.f32 %v572_v39, %v554_v45  ;;  %v538_v54 = vadd.f32 %v537_v27, %v519_v48  ;;  %953 = vmatpush.bf16.msra.mxu1 %v1412_v37  ;;  %v707_v45 = vld [vmem:[%s1943_s9 + $0x38] sm:$0xff] }
  0xb2   :  { %718 = vmatpush.msrb.mxu3 %v713_v30  ;;  %989 = vmatpush.msra.mxu2 %v713_v30 }
  0xb6   :  { %v520_v32 = vpop.f32.mrf.mxu0  ;;  %v556_v49 = vpop.f32.mrf.mxu2 }
  0xb7   :  { %v539_v33 = vpop.f32.mrf.mxu1  ;;  %v575_v56 = vpop.f32.mrf.mxu3  ;;  %v557_v57 = vadd.f32 %v556_v49, %v538_v54  ;;  %v521_v59 = vadd.f32 %v1429_v28, %v520_v32  ;;  %v1430_v28 = vld [vmem:[%s1942_s6] ss:$0 sm:$0xff] }
  0xb8   :  { %v1411_v54 = vld [vmem:[%s1944_s7 + $0x20] sm:$0xff] }
  0xb9   :  { %v576_v61 = vadd.f32 %v575_v56, %v557_v57  ;;  %v540_v2 = vadd.f32 %v539_v33, %v521_v59  ;;  %v712_v33 = vld [vmem:[%s1943_s9 + $0x60] sm:$0xff]  ;;  %954 = vmatpush.bf16.msra.mxu1 %v1411_v54  ;;  %v1410_v57 = vld [vmem:[%s1944_s7 + $0x18] sm:$0xff]  ;;  %v702_v59 = vld [vmem:[%s1943_s9 + $0x10] sm:$0xff] }
  0xba   :  { %719 = vmatpush.msrb.mxu3 %v712_v33  ;;  %990 = vmatpush.msra.mxu2 %v712_v33  ;;  %v704_v56 = vld [vmem:[%s1943_s9 + $0x20] sm:$0xff] }
  0xbc   :  { %720 = vmatpush.msrb.mxu3 %v711_v35  ;;  %991 = vmatpush.msra.mxu2 %v711_v35 }
  0xbd   :  { %955 = vmatpush.bf16.msra.mxu1 %v1410_v57 }
  0xbe   :  { %v589_v40 = vpop.f32.mrf.mxu0  ;;  %v558_v62 = vpop.f32.mrf.mxu2 }
  0xbf   :  { %v608_v41 = vpop.f32.mrf.mxu1  ;;  %v590_v43 = vadd.f32 %v589_v40, %v571_v38  ;;  %v559_v4 = vadd.f32 %v558_v62, %v540_v2  ;;  %v577_v6 = vpop.f32.mrf.mxu3  ;;  %v710_v38 = vld [vmem:[%s1943_s9 + $0x50] sm:$0xff]  ;;  %v700_v62 = vld [vmem:[%s1943_s9] sm:$0xff] }
  0xc0   :  { %721 = vmatpush.msrb.mxu3 %v710_v38  ;;  %992 = vmatpush.msra.mxu2 %v710_v38 }
  0xc1   :  { %v609_v46 = vadd.f32 %v608_v41, %v590_v43  ;;  %v578_v8 = vadd.f32 %v577_v6, %v559_v4  ;;  %v709_v41 = vld [vmem:[%s1943_s9 + $0x48] sm:$0xff]  ;;  %v708_v43 = vld [vmem:[%s1943_s9 + $0x40] sm:$0xff] }
  0xc2   :  { %722 = vmatpush.msrb.mxu3 %v709_v41  ;;  %993 = vmatpush.msra.mxu2 %v709_v41 }
  0xc3   :  { %v618_v50 = vmax.f32 %v609_v46, 0.0 }
  0xc4   :  { %723 = vmatpush.msrb.mxu3 %v708_v43  ;;  %994 = vmatpush.msra.mxu2 %v708_v43 }
  0xc5   :  { %779 = vst.msk [vmem:[#allocation2] sm:$0xff] %vm644_vm0, %v618_v50 }
  0xc6   :  { %v591_v52 = vpop.f32.mrf.mxu0  ;;  %724 = vmatpush.msrb.mxu3 %v707_v45  ;;  %995 = vmatpush.msra.mxu2 %v707_v45 }
  0xc7   :  { %v610_v53 = vpop.f32.mrf.mxu1  ;;  %v592_v55 = vadd.f32 %v591_v52, %v573_v51 }
  0xc8   :  { %725 = vmatpush.msrb.mxu3 %v706_v47  ;;  %996 = vmatpush.msra.mxu2 %v706_v47 }
  0xc9   :  { %v611_v58 = vadd.f32 %v610_v53, %v592_v55  ;;  %v705_v55 = vld [vmem:[%s1943_s9 + $0x28] sm:$0xff] }
  0xca   :  { %726 = vmatpush.msrb.mxu3 %v705_v55  ;;  %997 = vmatpush.msra.mxu2 %v705_v55 }
  0xcb   :  { %v619_v60 = vmax.f32 %v611_v58, 0.0  ;;  %v703_v58 = vld [vmem:[%s1943_s9 + $0x18] sm:$0xff] }
  0xcc   :  { %727 = vmatpush.msrb.mxu3 %v704_v56  ;;  %998 = vmatpush.msra.mxu2 %v704_v56 }
  0xcd   :  { %v622_v63 = vpack.c.bf16 %v619_v60, %v618_v50  ;;  %781 = vrot.lane.b32.xlu0 %v619_v60, %s1463_s15  ;;  %v1409_v60 = vld [vmem:[%s1944_s7 + $0x10] sm:$0xff] }
  0xce   :  { %v594_v0 = vpop.f32.mrf.mxu0  ;;  %728 = vmatpush.msrb.mxu3 %v703_v58  ;;  %999 = vmatpush.msra.mxu2 %v703_v58 }
  0xcf   :  { %v613_v1 = vpop.f32.mrf.mxu1  ;;  %v595_v3 = vadd.f32 %v594_v0, %v576_v61  ;;  %1271 = vmatmul.msk.bf16.vlgmr.msrb.gmra.mxu2 %vm644_vm0, %v622_v63  ;;  %v701_v61 = vld [vmem:[%s1943_s9 + $0x8] sm:$0xff]  ;;  %956 = vmatpush.bf16.msra.mxu1 %v1409_v60  ;;  %v1407_v0 = vld [vmem:[%s1944_s7] sm:$0xff] }
  0xd0   :  { %729 = vmatpush.msrb.mxu3 %v702_v59  ;;  %1000 = vmatpush.msra.mxu2 %v702_v59  ;;  %v1408_v63 = vld [vmem:[%s1944_s7 + $0x8] sm:$0xff] }
  0xd1   :  { %v614_v5 = vadd.f32 %v613_v1, %v595_v3 }
  0xd2   :  { %730 = vmatpush.msrb.mxu3 %v701_v61  ;;  %1001 = vmatpush.msra.mxu2 %v701_v61 }
  0xd3   :  { %v620_v7 = vmax.f32 %v614_v5, 0.0  ;;  %957 = vmatpush.bf16.msra.mxu1 %v1408_v63 }
  0xd4   :  { %731 = vmatpush.msrb.mxu3 %v700_v62  ;;  %1002 = vmatpush.msra.mxu2 %v700_v62 }
  0xd5   :  { %787 = vrot.lane.b32.xlu0 %v620_v7, %s1464_s16 }
  0xd6   :  { %v596_v9 = vpop.f32.mrf.mxu0 }
  0xd7   :  { %v597_v10 = vadd.f32 %v596_v9, %v578_v8  ;;  %v615_v11 = vpop.f32.mrf.mxu1  ;;  %958 = vmatpush.bf16.msra.mxu1 %v1407_v0  ;;  %v1431_v8 = vld [vmem:[%s1945_s4] ss:$0 sm:$0xff] }
  0xd9   :  { %v616_v12 = vadd.f32 %v615_v11, %v597_v10 }
  0xdb   :  { %v621_v13 = vmax.f32 %v616_v12, 0.0 }
  0xdd   :  { %v623_v14 = vpack.c.bf16 %v621_v13, %v620_v7  ;;  %793 = vrot.lane.b32.xlu1 %v621_v13, %s1465_s17 }
  0xdf   :  { %1272 = vmatmul.msk.bf16.gmra.mxu2 %vm644_vm0, %v623_v14 }
 0x13f   :  { %v782_v21 = vpop.permute.xlu0 %781 }
 0x140   :  { %785 = vst.msk [vmem:[#allocation2] sm:$0xff] %vm784_vm1, %v782_v21 }
 0x147   :  { %v788_v22 = vpop.permute.xlu0 %787 }
 0x148   :  { %791 = vst.msk [vmem:[#allocation2] sm:$0xff] %vm790_vm2, %v788_v22 }
 0x14f   :  { %v794_v27 = vpop.permute.xlu1 %793 }
 0x150   :  { %797 = vst.msk [vmem:[#allocation2] sm:$0xff] %vm796_vm3, %v794_v27 }
 0x152   :  { %v660_v32 = vpop.f32.mrf.mxu2 }
 0x153   :  { %v1802_v34 = vadd.f32 %v1430_v28, %v660_v32 }
 0x155   :  { %v672_v36 = vsel %vm40_vm4, %v1802_v34, -inf }
 0x156   :  { %676 = vmax.xlane.f32.xlu1 %v672_v36 }
 0x157   :  { %v798_v39 = vld [vmem:[#allocation2] sm:$0xff] }
 0x158   :  { %v799_v40 = vpack.c.bf16 %v798_v39, %v798_v39 }
 0x15a   :  { %v662_v42 = vpop.f32.mrf.mxu2  ;;  %876 = vmatmul.bf16.vlgmr.msra.gmra.mxu0 %v799_v40 }
 0x15b   :  { %v1822_v44 = vadd.f32 %v1430_v28, %v662_v42 }
 0x15d   :  { %v673_v46 = vsel %vm40_vm4, %v1822_v44, -inf }
 0x15e   :  { %678 = vmax.xlane.f32.xlu2 %v673_v46 }
 0x162   :  { %v665_v48 = vpop.f32.mrf.mxu2 }
 0x163   :  { %v1833_v49 = vadd.f32 %v1430_v28, %v665_v48 }
 0x165   :  { %v674_v50 = vsel %vm40_vm4, %v1833_v49, -inf }
 0x166   :  { %680 = vmax.xlane.f32.xlu2 %v674_v50 }
 0x16a   :  { %v667_v51 = vpop.f32.mrf.mxu2 }
 0x16b   :  { %v1838_v52 = vadd.f32 %v1430_v28, %v667_v51  ;;  %v1432_v28 = vld [vmem:[%s1946_s8] ss:$0 sm:$0xff] }
 0x16d   :  { %v675_v53 = vsel %vm40_vm4, %v1838_v52, -inf }
 0x16e   :  { %682 = vmax.xlane.f32.xlu0 %v675_v53 }
 0x1c9   :  { %v677_v1 = vpop.xlane.xlu1 %676 }
 0x1ca   :  { %v684_v2 = vsub.f32 %v1802_v34, %v677_v1 }
 0x1cc   :  { %v688_v3 = vsel %vm40_vm4, %v684_v2, -30.0 }
 0x1cd   :  { %v692_v4 = vmul.f32 1.442695, %v688_v3 }
 0x1cf   :  { %1433 = vpow2.f32 %v692_v4 }
 0x1d1   :  { %v679_v5 = vpop.xlane.xlu2 %678 }
 0x1d2   :  { %v685_v6 = vsub.f32 %v1822_v44, %v679_v5 }
 0x1d4   :  { %v689_v7 = vsel %vm40_vm4, %v685_v6, -30.0 }
 0x1d5   :  { %v1434_v9 = vpop.eup %1433  ;;  %v694_v10 = vmul.f32 1.442695, %v689_v7 }
 0x1d6   :  { %732 = vmatmul.f32.vlgmr.msrb.gmra.mxu3 %v1434_v9 }
 0x1d7   :  { %1435 = vpow2.f32 %v694_v10  ;;  %v877_v11 = vpop.f32.mrf.mxu0 }
 0x1d8   :  { %v878_v12 = vadd.f32 %v1431_v8, %v877_v11 }
 0x1d9   :  { %v681_v13 = vpop.xlane.xlu2 %680 }
 0x1da   :  { %v881_v14 = vmax.f32 %v878_v12, 0.0  ;;  %v686_v15 = vsub.f32 %v1833_v49, %v681_v13 }
 0x1dc   :  { %v882_v16 = vpack.c.bf16 %v881_v14, %v881_v14  ;;  %v690_v17 = vsel %vm40_vm4, %v686_v15, -30.0 }
 0x1dd   :  { %v1436_v18 = vpop.eup %1435  ;;  %v696_v19 = vmul.f32 1.442695, %v690_v17 }
 0x1de   :  { %735 = vmatmul.f32.gmra.mxu3 %v1436_v18  ;;  %959 = vmatmul.bf16.vlgmr.msra.gmra.mxu1 %v882_v16 }
 0x1df   :  { %1437 = vpow2.f32 %v696_v19  ;;  %v879_v20 = vpop.f32.mrf.mxu0 }
 0x1e1   :  { %v683_v21 = vpop.xlane.xlu0 %682 }
 0x1e2   :  { %v687_v22 = vsub.f32 %v1838_v52, %v683_v21 }
 0x1e4   :  { %v691_v23 = vsel %vm40_vm4, %v687_v22, -30.0 }
 0x1e5   :  { %v1438_v25 = vpop.eup %1437  ;;  %v698_v26 = vmul.f32 1.442695, %v691_v23 }
 0x1e6   :  { %738 = vmatmul.f32.gmra.mxu3 %v1438_v25 }
 0x1e7   :  { %1439 = vpow2.f32 %v698_v26 }
 0x1ed   :  { %v1440_v27 = vpop.eup %1439 }
 0x1ee   :  { %741 = vmatmul.f32.gmra.mxu3 %v1440_v27 }
 0x259   :  { %v733_v29 = vpop.f32.mrf.mxu3 }
 0x25a   :  { %1441 = vrcp.f32 %v733_v29 }
 0x25b   :  { %v960_v30 = vpop.f32.mrf.mxu1  ;;  %1443 = vtanh.f32 %v1802_v34 }
 0x25c   :  { %v961_v31 = vadd.f32 %v1432_v28, %v960_v30  ;;  %1445 = vtanh.f32 %v1822_v44 }
 0x25e   :  { %v964_v32 = vsel %vm40_vm4, %v961_v31, -inf }
 0x25f   :  { %965 = vmax.xlane.f32.xlu2 %v964_v32 }
 0x260   :  { %v1442_v35 = vpop.eup %1441 }
 0x261   :  { %v736_v33 = vpop.f32.mrf.mxu3  ;;  %v749_v37 = vmul.f32 %v1442_v35, %v1434_v9  ;;  %v1444_v38 = vpop.eup %1443 }
 0x262   :  { %1447 = vrcp.f32 %v736_v33  ;;  %v1446_v39 = vpop.eup %1445  ;;  %v763_v44 = vsel %vm1900_vm7, %v1444_v38, 0.0 }
 0x263   :  { %v962_v36 = vpop.f32.mrf.mxu1  ;;  %v753_v34 = vsel %vm40_vm4, %v749_v37, 0.0  ;;  %v764_v46 = vsel %vm1900_vm7, %v1446_v39, 0.0 }
 0x264   :  { %v767_v47 = vadd.f32 %v763_v44, %v753_v34 }
 0x268   :  { %v1448_v40 = vpop.eup %1447 }
 0x269   :  { %v750_v42 = vmul.f32 %v1448_v40, %v1436_v18  ;;  %v739_v43 = vpop.f32.mrf.mxu3 }
 0x26a   :  { %1449 = vrcp.f32 %v739_v43 }
 0x26b   :  { %v754_v45 = vsel %vm40_vm4, %v750_v42, 0.0  ;;  %1451 = vtanh.f32 %v1833_v49 }
 0x26c   :  { %v768_v48 = vadd.f32 %v764_v46, %v754_v45  ;;  %1453 = vtanh.f32 %v1838_v52 }
 0x26e   :  { %v1418_v50 = vpack.c.bf16 %v768_v48, %v767_v47 }
 0x270   :  { %1419 = vst [vmem:[%s1947_s10] sm:$0xff] %v1418_v50   ;;  %v1450_v53 = vpop.eup %1449 }
 0x271   :  { %v742_v51 = vpop.f32.mrf.mxu3  ;;  %v751_v54 = vmul.f32 %v1450_v53, %v1438_v25  ;;  %v1452_v55 = vpop.eup %1451 }
 0x272   :  { %1455 = vrcp.f32 %v742_v51  ;;  %v1454_v56 = vpop.eup %1453  ;;  %v765_v49 = vsel %vm1900_vm7, %v1452_v55, 0.0 }
 0x273   :  { %v755_v58 = vsel %vm40_vm4, %v751_v54, 0.0  ;;  %v766_v52 = vsel %vm1900_vm7, %v1454_v56, 0.0 }
 0x274   :  { %v769_v61 = vadd.f32 %v765_v49, %v755_v58 }
 0x278   :  { %v1456_v57 = vpop.eup %1455 }
 0x279   :  { %v752_v59 = vmul.f32 %v1456_v57, %v1440_v27 }
 0x27b   :  { %v756_v60 = vsel %vm40_vm4, %v752_v59, 0.0 }
 0x27c   :  { %v770_v62 = vadd.f32 %v766_v52, %v756_v60 }
 0x27e   :  { %v1423_v63 = vpack.c.bf16 %v770_v62, %v769_v61 }
 0x280   :  { %1425 = vst [vmem:[%s1947_s10 + $0x8] sm:$0xff] %v1423_v63  }
 0x2d2   :  { %v966_v0 = vpop.xlane.xlu2 %965 }
 0x2d3   :  { %v967_v1 = vsub.f32 %v961_v31, %v966_v0 }
 0x2d5   :  { %v968_v2 = vsel %vm40_vm4, %v967_v1, -30.0 }
 0x2d6   :  { %v969_v3 = vmul.f32 1.442695, %v968_v2 }
 0x2d8   :  { %1457 = vpow2.f32 %v969_v3 }
 0x2d9   :  { %1459 = vtanh.f32 %v961_v31 }
 0x2de   :  { %v1458_v4 = vpop.eup %1457 }
 0x2df   :  { %1003 = vmatmul.f32.vlgmr.msra.gmra.mxu2 %v1458_v4  ;;  %v1460_v6 = vpop.eup %1459 }
 0x2e0   :  { %v1011_v10 = vsel %vm1900_vm7, %v1460_v6, 0.0 }
 0x362   :  { %v1004_v5 = vpop.f32.mrf.mxu2 }
 0x363   :  { %1461 = vrcp.f32 %v1004_v5 }
 0x369   :  { %v1462_v7 = vpop.eup %1461 }
 0x36a   :  { %v1008_v8 = vmul.f32 %v1462_v7, %v1458_v4 }
 0x36c   :  { %v1009_v9 = vsel %vm40_vm4, %v1008_v8, 0.0 }
 0x36d   :  { %v1012_v11 = vadd.f32 %v1011_v10, %v1009_v9 }
 0x36f   :  { %v1013_v12 = vpack.c.bf16 %v1012_v11, %v1012_v11 }
 0x371   :  { %1014 = vst [vmem:[%s1948_s11] sm:$0xf] %v1013_v12 }

</bundles_post_ra>
